<compile_context>
chip_gen: v7x
topology: tpu7x:2x2x1
jax: 0.10.0
libtpu: 0.0.40
codegen_flags: <defaults>
</compile_context>

<pallas_src>
import functools

import jax
import jax.numpy as jnp
from jax.experimental import pallas as pl
from jax.experimental.pallas import tpu as pltpu


def _round_up(x, m):
    return (x + m - 1) // m * m


def _ffn_kernel(x_ref, w1_ref, b1_ref, w2_ref, b2_ref, o_ref, acc_ref, *,
                add_identity):
    """One (token_tile, hidden_tile) grid step of the 2-layer FFN."""
    h = pl.program_id(1)

    @pl.when(h == 0)
    def _init():
        acc_ref[...] = jnp.zeros_like(acc_ref)

    x = x_ref[...]                                            # (tm, De)

    # fc1 tile + bias + ReLU.  ffn_drop = 0.0 -> dropout is an identity.
    # TODO(synk): dropout (ffn_drop > 0 in training mode) not implemented.
    hid = jnp.dot(x, w1_ref[...], preferred_element_type=jnp.float32)
    hid = hid + b1_ref[...].astype(jnp.float32)               # (tm, tf)
    hid = jnp.maximum(hid, 0.0)                               # ReLU

    # fc2 partial product, accumulated over hidden tiles in f32.
    acc_ref[...] += jnp.dot(hid.astype(w2_ref.dtype), w2_ref[...],
                            preferred_element_type=jnp.float32)

    @pl.when(h == pl.num_programs(1) - 1)
    def _finalize():
        out = acc_ref[...] + b2_ref[...].astype(jnp.float32)
        if add_identity:
            out = out + x.astype(jnp.float32)                 # fused residual
        o_ref[...] = out.astype(o_ref.dtype)


@functools.partial(jax.jit, static_argnames=("add_identity", "interpret"))
def ffn_forward(x, w1, b1, w2, b2, identity=None, *, add_identity=True,
                interpret=False):
    """Pallas equivalent of FFN.forward (num_fcs=2, eval mode / ffn_drop=0).

    x:  (..., embed_dims)
    w1: (embed_dims, feedforward_channels), b1: (feedforward_channels,)
    w2: (feedforward_channels, embed_dims), b2: (embed_dims,)
    """
    # TODO(synk): num_fcs > 2 (extra Linear+ReLU stages) not implemented.
    orig_shape = x.shape
    De = orig_shape[-1]
    F = w1.shape[1]
    assert w1.shape == (De, F) and w2.shape == (F, De)

    x2 = x.reshape(-1, De)
    N = x2.shape[0]

    # Token tile: multiple of 8 (sublane); 256 for large N to amortize the
    # per-grid-step overhead while staying far under VMEM on v7x (64 MiB).
    tm = 256 if N >= 256 else _round_up(N, 8)
    Np = _round_up(N, tm)
    if Np != N:
        x2 = jnp.pad(x2, ((0, Np - N), (0, 0)))

    # Hidden tile: 512 (lane-aligned) when it divides F, else the full hidden
    # dim (block == full array dim satisfies the (8,128) rule).
    tf = 512 if (F > 512 and F % 512 == 0) else F

    fuse_identity = bool(add_identity) and identity is None

    b1_2 = b1.reshape(1, F)
    b2_2 = b2.reshape(1, De)

    cost = pl.CostEstimate(
        flops=4 * Np * De * F,                       # two matmuls
        transcendentals=0,
        bytes_accessed=(x2.size + w1.size + b1.size + w2.size + b2.size
                        + Np * De) * x2.dtype.itemsize,
    )

    out = pl.pallas_call(
        functools.partial(_ffn_kernel, add_identity=fuse_identity),
        out_shape=jax.ShapeDtypeStruct((Np, De), x.dtype),
        grid_spec=pltpu.PrefetchScalarGridSpec(
            num_scalar_prefetch=0,
            grid=(Np // tm, F // tf),
            in_specs=[
                pl.BlockSpec((tm, De), lambda i, h: (i, 0)),   # x (resident over h)
                pl.BlockSpec((De, tf), lambda i, h: (0, h)),   # w1 hidden tile
                pl.BlockSpec((1, tf), lambda i, h: (0, h)),    # b1 hidden tile
                pl.BlockSpec((tf, De), lambda i, h: (h, 0)),   # w2 hidden tile
                pl.BlockSpec((1, De), lambda i, h: (0, 0)),    # b2
            ],
            out_specs=pl.BlockSpec((tm, De), lambda i, h: (i, 0)),
            scratch_shapes=[pltpu.VMEM((tm, De), jnp.float32)],
        ),
        compiler_params=pltpu.CompilerParams(
            dimension_semantics=("parallel", "arbitrary"),
            vmem_limit_bytes=32 * 1024 * 1024,
        ),
        cost_estimate=cost,
        interpret=interpret,
    )(x2, w1, b1_2, w2, b2_2)

    out = out[:N].reshape(orig_shape)
    if add_identity and identity is not None:
        # Explicit identity tensor supplied by the caller (rare path).
        out = out + identity
    return out


def _reference(x, w1, b1, w2, b2, add_identity=True):
    hid = jnp.maximum(
        jnp.einsum("ble,ef->blf", x, w1,
                   precision=jax.lax.Precision.HIGHEST) + b1, 0.0)
    out = jnp.einsum("blf,fe->ble", hid, w2,
                     precision=jax.lax.Precision.HIGHEST) + b2
    return x + out if add_identity else out


if __name__ == "__main__":
    key = jax.random.PRNGKey(0)
    kx, k1, k2, k3, k4 = jax.random.split(key, 5)

    B, L = 2, 8                              # small token count
    embed_dims, feedforward_channels = 256, 1024   # module defaults

    x = jax.random.normal(kx, (B, L, embed_dims), dtype=jnp.float32)
    w1 = jax.random.normal(k1, (embed_dims, feedforward_channels),
                           dtype=jnp.float32) * (embed_dims ** -0.5)
    b1 = 0.01 * jax.random.normal(k2, (feedforward_channels,), dtype=jnp.float32)
    w2 = jax.random.normal(k3, (feedforward_channels, embed_dims),
                           dtype=jnp.float32) * (feedforward_channels ** -0.5)
    b2 = 0.01 * jax.random.normal(k4, (embed_dims,), dtype=jnp.float32)

    # default path: add_identity=True, identity=None -> residual fused in kernel
    out = jax.block_until_ready(ffn_forward(x, w1, b1, w2, b2))
    ref = _reference(x, w1, b1, w2, b2, add_identity=True)
    assert out.shape == x.shape, out.shape
    assert jnp.allclose(out, ref, atol=1e-4, rtol=1e-4), float(
        jnp.max(jnp.abs(out - ref)))

    # no-identity path
    out_ni = jax.block_until_ready(
        ffn_forward(x, w1, b1, w2, b2, add_identity=False))
    ref_ni = _reference(x, w1, b1, w2, b2, add_identity=False)
    assert jnp.allclose(out_ni, ref_ni, atol=1e-4, rtol=1e-4), float(
        jnp.max(jnp.abs(out_ni - ref_ni)))

    print("KERNEL_OK")
</pallas_src>

<mosaic_0001>
module attributes {stable_mosaic.version = 11 : i64} {
  func.func @_ffn_kernel(%arg0: i32, %arg1: i32, %arg2: memref<16x256xf32, #tpu.memory_space<vmem>>, %arg3: memref<256x512xf32, #tpu.memory_space<vmem>>, %arg4: memref<1x512xf32, #tpu.memory_space<vmem>>, %arg5: memref<512x256xf32, #tpu.memory_space<vmem>>, %arg6: memref<1x256xf32, #tpu.memory_space<vmem>>, %arg7: memref<16x256xf32, #tpu.memory_space<vmem>>, %arg8: memref<16x256xf32, #tpu.memory_space<vmem>>) attributes {dimension_semantics = [#tpu.dimension_semantics<parallel>, #tpu.dimension_semantics<arbitrary>], iteration_bounds = array<i64: 1, 2>, scalar_prefetch = 0 : i64, scratch_operands = 1 : i64, tpu.core_type = #tpu.core_type<tc>, window_params = [{transform_indices = @transform_0, window_bounds = array<i64: 16, 256>}, {transform_indices = @transform_1, window_bounds = array<i64: 256, 512>}, {transform_indices = @transform_2, window_bounds = array<i64: 1, 512>}, {transform_indices = @transform_3, window_bounds = array<i64: 512, 256>}, {pipeline_mode = #tpu.pipeline_mode<synchronous>, transform_indices = @transform_4, window_bounds = array<i64: 1, 256>}, {transform_indices = @transform_5, window_bounds = array<i64: 16, 256>}]} {
    %c0_i32 = arith.constant 0 : i32
    %0 = arith.cmpi eq, %arg1, %c0_i32 : i32
    %1 = arith.extui %0 : i1 to i32
    %c0_i32_0 = arith.constant 0 : i32
    %2 = arith.cmpi ne, %1, %c0_i32_0 : i32
    scf.if %2 {
      %cst_15 = arith.constant 0.000000e+00 : f32
      %19 = vector.broadcast %cst_15 : f32 to vector<16x256xf32>
      %c0_16 = arith.constant 0 : index
      %c0_17 = arith.constant 0 : index
      %20 = vector.load %arg8[%c0_16, %c0_17] : memref<16x256xf32, #tpu.memory_space<vmem>>, vector<16x256xf32>
      tpu.vector_store %arg8[%c0_16, %c0_17], %19 {strides = array<i32>} : memref<16x256xf32, #tpu.memory_space<vmem>>, vector<16x256xf32>,
    } else {
    }
    %c0 = arith.constant 0 : index
    %c0_1 = arith.constant 0 : index
    %3 = vector.load %arg2[%c0, %c0_1] : memref<16x256xf32, #tpu.memory_space<vmem>>, vector<16x256xf32>
    %c0_2 = arith.constant 0 : index
    %c0_3 = arith.constant 0 : index
    %4 = vector.load %arg3[%c0_2, %c0_3] : memref<256x512xf32, #tpu.memory_space<vmem>>, vector<256x512xf32>
    %cst = arith.constant dense<0.000000e+00> : vector<16x512xf32>
    %5 = tpu.matmul %3, %4, %cst {dimension_numbers = #tpu.dot_dimension_numbers<[1], [0], [0], [1], [0, 0, 1, 1], [], []>} : vector<16x256xf32>, vector<256x512xf32>, vector<16x512xf32> -> vector<16x512xf32>
    %c0_4 = arith.constant 0 : index
    %c0_5 = arith.constant 0 : index
    %6 = vector.load %arg4[%c0_4, %c0_5] : memref<1x512xf32, #tpu.memory_space<vmem>>, vector<1x512xf32>
    %7 = vector.broadcast %6 : vector<1x512xf32> to vector<16x512xf32>
    %8 = arith.addf %5, %7 : vector<16x512xf32>
    %cst_6 = arith.constant 0.000000e+00 : f32
    %9 = vector.broadcast %cst_6 : f32 to vector<16x512xf32>
    %10 = arith.maximumf %8, %9 : vector<16x512xf32>
    %c0_7 = arith.constant 0 : index
    %c0_8 = arith.constant 0 : index
    %11 = vector.load %arg8[%c0_7, %c0_8] : memref<16x256xf32, #tpu.memory_space<vmem>>, vector<16x256xf32>
    %c0_9 = arith.constant 0 : index
    %c0_10 = arith.constant 0 : index
    %12 = vector.load %arg5[%c0_9, %c0_10] : memref<512x256xf32, #tpu.memory_space<vmem>>, vector<512x256xf32>
    %cst_11 = arith.constant dense<0.000000e+00> : vector<16x256xf32>
    %13 = tpu.matmul %10, %12, %cst_11 {dimension_numbers = #tpu.dot_dimension_numbers<[1], [0], [0], [1], [0, 0, 1, 1], [], []>} : vector<16x512xf32>, vector<512x256xf32>, vector<16x256xf32> -> vector<16x256xf32>
    %14 = arith.addf %11, %13 : vector<16x256xf32>
    %c0_12 = arith.constant 0 : index
    %c0_13 = arith.constant 0 : index
    %15 = vector.load %arg8[%c0_12, %c0_13] : memref<16x256xf32, #tpu.memory_space<vmem>>, vector<16x256xf32>
    tpu.vector_store %arg8[%c0_12, %c0_13], %14 {strides = array<i32>} : memref<16x256xf32, #tpu.memory_space<vmem>>, vector<16x256xf32>,
    %c1_i32 = arith.constant 1 : i32
    %16 = arith.cmpi eq, %arg1, %c1_i32 : i32
    %17 = arith.extui %16 : i1 to i32
    %c0_i32_14 = arith.constant 0 : i32
    %18 = arith.cmpi ne, %17, %c0_i32_14 : i32
    scf.if %18 {
      %c0_15 = arith.constant 0 : index
      %c0_16 = arith.constant 0 : index
      %19 = vector.load %arg8[%c0_15, %c0_16] : memref<16x256xf32, #tpu.memory_space<vmem>>, vector<16x256xf32>
      %c0_17 = arith.constant 0 : index
      %c0_18 = arith.constant 0 : index
      %20 = vector.load %arg6[%c0_17, %c0_18] : memref<1x256xf32, #tpu.memory_space<vmem>>, vector<1x256xf32>
      %21 = vector.broadcast %20 : vector<1x256xf32> to vector<16x256xf32>
      %22 = arith.addf %19, %21 : vector<16x256xf32>
      %23 = arith.addf %22, %3 : vector<16x256xf32>
      %c0_19 = arith.constant 0 : index
      %c0_20 = arith.constant 0 : index
      %24 = vector.load %arg7[%c0_19, %c0_20] : memref<16x256xf32, #tpu.memory_space<vmem>>, vector<16x256xf32>
      tpu.vector_store %arg7[%c0_19, %c0_20], %23 {strides = array<i32>} : memref<16x256xf32, #tpu.memory_space<vmem>>, vector<16x256xf32>,
    } else {
    }
    return
  }
  func.func @transform_0(%arg0: i32, %arg1: i32) -> (i32, i32) {
    %c0_i32 = arith.constant 0 : i32
    %c0_i32_0 = arith.constant 0 : i32
    return %arg0, %c0_i32 : i32, i32
  }
  func.func @transform_1(%arg0: i32, %arg1: i32) -> (i32, i32) {
    %c0_i32 = arith.constant 0 : i32
    %c0_i32_0 = arith.constant 0 : i32
    return %c0_i32, %arg1 : i32, i32
  }
  func.func @transform_2(%arg0: i32, %arg1: i32) -> (i32, i32) {
    %c0_i32 = arith.constant 0 : i32
    %c0_i32_0 = arith.constant 0 : i32
    return %c0_i32, %arg1 : i32, i32
  }
  func.func @transform_3(%arg0: i32, %arg1: i32) -> (i32, i32) {
    %c0_i32 = arith.constant 0 : i32
    %c0_i32_0 = arith.constant 0 : i32
    return %arg1, %c0_i32 : i32, i32
  }
  func.func @transform_4(%arg0: i32, %arg1: i32) -> (i32, i32) {
    %c0_i32 = arith.constant 0 : i32
    %c0_i32_0 = arith.constant 0 : i32
    %c0_i32_1 = arith.constant 0 : i32
    return %c0_i32, %c0_i32_0 : i32, i32
  }
  func.func @transform_5(%arg0: i32, %arg1: i32) -> (i32, i32) {
    %c0_i32 = arith.constant 0 : i32
    %c0_i32_0 = arith.constant 0 : i32
    return %arg0, %c0_i32 : i32, i32
  }
}

</mosaic_0001>

<bundles_post_ra>
// kernel: ffn_forward.1
= control target key start
LH: loop header
LB: loop body
LE: loop exit
PB: predicated region body
PF: predicated region fallthrough
CT: control target
= control target key end

     0   :  { %s2233_s0 = inlined_call_operand.hbm [shape: f32[16,256], index: 0, kind: input, shape index: {}]   ;;  %s2234_s1 = inlined_call_operand.hbm [shape: f32[256,1024], index: 1, kind: input, shape index: {}]   ;;  %s2235_s2 = inlined_call_operand.vmem [shape: f32[1,1024], index: 2, kind: input, shape index: {}]   ;;  %s2236_s3 = inlined_call_operand.hbm [shape: f32[1024,256], index: 3, kind: input, shape index: {}]   ;;  %s2237_s4 = inlined_call_operand.vmem [shape: f32[1,256], index: 4, kind: input, shape index: {}]   ;;  %s2238_s5 = inlined_call_operand.hbm [shape: f32[16,256], index: 5, kind: output, shape index: {}]  }
   0x1   :  { %2245 = sst [smem:[#allocation13_spill]] %s2234_s1 }
   0x2   :  { %10 = vsyncpa [#allocation4], 0 }
   0x3   :  { %11 = vsyncpa [#allocation7], 0 }
   0x4   :  { %13 = vsyncpa [#allocation7 + $0x1], 0 }
   0x5   :  { %14 = vsyncpa [#allocation5], 0  ;;  %s1687_s18 = smov 0   ;;  %s1689_s19 = smov 0  }
   0x6   :  { %s1691_s20 = smov 0   ;;  %s1693_s21 = smov 0  }
   0x7   :  { %s1695_s22 = smov 0   ;;  %s1697_s23 = smov 0  }
   0x8 LB: > { %s29_s24 = sadd.s32 1, %s1639_s22  ;;  %s65_s25 = sadd.s32 1, %s1631_s20  ;;  %s1643_s23 = sphi %s1697_s23, %s20_s23   ;;  %s1639_s22 = sphi %s1695_s22, %s2262_s22   ;;  %s1635_s21 = sphi %s1693_s21, %s2261_s21   ;;  %s1631_s20 = sphi %s1691_s20, %s2260_s20   ;;  %s1627_s19 = sphi %s1689_s19, %s2259_s19   ;;  %s1623_s18 = sphi %s1687_s18, %s2258_s18  }
   0x9   : > { %p30_p0 = scmp.ge.s32.totalorder %s29_s24, 2  ;;  %p72_p1 = scmp.ne.s32.totalorder %s1631_s20, %s1627_s19 }
   0xa   : > { %p73_p2 = scmp.eq.s32.totalorder %s1643_s23, 0  ;;  %p1409_p4 = scmp.lt.s32.totalorder %s1643_s23, 2 }
   0xb   : > { %s2264_s24 = smov (%p30_p0, %s29_s24), 0  ;;  %s221_s27 = sand.u32 1, %s1643_s23  }
   0xc   : > { %p74_p3 = por %p73_p2, %p72_p1  ;;  %s62_s26 = ssub.s32 %s1639_s22, %s2264_s24 }
   0xd   : > { %p63_p5 = scmp.eq.s32.totalorder %s62_s26, 0  ;;  %s223_s28 = sand.u32 1, %s1631_s20  }
   0xe   : > { %s1122_s29 = sshll.u32 %s1639_s22, 9  ;;  %s1733_s6 = sshll.u32 %s223_s28, 10 }
   0xf   : > { %s1731_s30 = scalar_select %p63_p5, %s1631_s20, %s65_s25  }
  0x10   : > { %s2246_s1 = sld [smem:[#allocation13_spill]]  ;;  %p1740_p6 = pnand %p1409_p4, %p74_p3 }
  0x11   : > { %s225_s11 = scalar_lea.vmem [#allocation6], %s1733_s6  ;;  %s1747_s13 = scalar_lea.sflag [#allocation7], %s221_s27 }
  0x12   : > { %s2247_s10 = scalar_select %p1740_p6, 1, 0 }
  0x13   : > { %s232_s12 = sshll.u32 %s225_s11, 4  ;;  %p2240_p8 = pneg %p1740_p6  ;;  %s1745_s12 = int_to_ptr.vmem [resolvable:$true] %s232_s12 }
  0x16   : > { %s1738_s9 = scalar_lea.hbm %s2246_s1, %s1122_s29  ;;  %s1476_s17 = scalar_lea.hbm %s2246_s1, 32768 }
  0x17   : > { %s1471_s14 = scalar_lea.hbm %s1738_s9, 16384  ;;  %p1477_p11 = scmp.lt.u32.totalorder %s1738_s9, %s2246_s1 }
  0x18   : > { %p1472_p7 = scmp.ne.s32.totalorder %s1738_s9, %s1471_s14  ;;  %p1478_p12 = scmp.lt.u32.totalorder %s1476_s17, %s1471_s14 }
  0x19   : > { %p1480_p0 = scmp.lt.u32.totalorder %s1471_s14, %s1738_s9 }
  0x1a   : > { %p1474_p9 = pnand %p2240_p8, %p1472_p7  ;;  %p1479_p13 = por %p1478_p12, %p1477_p11 }
  0x1c   : > { %p1475_p10 = pneg %p1474_p9  ;;  %p1481_p1 = por %p1480_p0, %p1479_p13 }
  0x1e   : > { %p1482_p2 = pnand %p1481_p1, %p1475_p10 }
  0x20   : > { %1485 = shalt.err (!%p1482_p2)
}
  0x21   : > { %s1486_s27 = scalar_lea.vmem %s1745_s12, 16384  ;;  %s1645_s28 = smov [#allocation6]  }
  0x22   : > { %p1487_p3 = scmp.ne.s32.totalorder %s1745_s12, %s1486_s27  ;;  %s1491_s29 = sshll.u32 %s1645_s28, 4  ;;  %s1492_s29 = int_to_ptr.vmem [resolvable:$false] %s1491_s29 }
  0x23   : > { %s1493_s7 = scalar_lea.vmem %s1492_s29, 32768  ;;  %p1494_p7 = scmp.lt.s32.totalorder %s1745_s12, %s1492_s29 }
  0x24   : > { %p1489_p4 = pnand %p1487_p3, %p2240_p8  ;;  %p1495_p9 = scmp.lt.s32.totalorder %s1493_s7, %s1486_s27 }
  0x26   : > { %p1490_p5 = pneg %p1489_p4  ;;  %p1496_p11 = por %p1495_p9, %p1494_p7 }
  0x28   : > { %p1497_p12 = pnand %p1496_p11, %p1490_p5 }
  0x2a   : > { %1500 = shalt.err (!%p1497_p12)
}
  0x2b   : > { %s1646_s8 = smov 1024   ;;  %s1647_s11 = smov 512  }
  0x2c   : > { %s1648_s14 = smov 32   ;;  %s1776_s15 = sadd.s32 4294967295, %s1643_s23  }
  0x2d   : > { %1404 = dma.hbm_to_vmem [thread:$0]  (!%p1740_p6), %s1738_s9, 16384, %s1745_s12, %s1747_s13, %s1646_s8, %s1647_s11, %s1648_s14  }
  0x2e   : > { %p78_p10 = scmp.ne.s32.totalorder %s1627_s19, %s1623_s18  ;;  %p2239_p13 = scmp.eq.s32.totalorder %s1776_s15, 0 }
  0x2f   : > { %p1101_p0 = scmp.ge.s32.totalorder %s1643_s23, 1  ;;  %p188_p1 = scmp.lt.s32.totalorder %s1643_s23, 3 }
  0x30   : > { %p1785_p2 = por %p2239_p13, %p78_p10  ;;  %s1649_s9 = smov [#allocation3]  }
  0x31   : > { %p1789_p3 = pnand %p1101_p0, %p188_p1  ;;  %s204_s12 = sshll.u32 %s1649_s9, 4  ;;  %s1793_s12 = int_to_ptr.vmem [resolvable:$true] %s204_s12 }
  0x32   : > { %s2248_s16 = scalar_select %p1785_p2, 1, 0 }
  0x33   : > { %s2249_s17 = scalar_select %p1789_p3, 1, 0 }
  0x34   : > { %p1397_p4 = pneg %p1789_p3  ;;  %s1124_s18 = sshll.u32 %s1639_s22, 14 }
  0x35   : > { %s1807_s28 = scalar_lea.hbm %s2236_s3, %s1124_s18  ;;  %s254_s29 = scalar_lea.vmem [#allocation8], %s1733_s6 }
  0x36   : > { %p1800_p5 = pnand %p1397_p4, %p2239_p13  ;;  %s262_s7 = sshll.u32 %s254_s29, 4  ;;  %s1810_s7 = int_to_ptr.vmem [resolvable:$true] %s262_s7 }
  0x37   : > { %s1501_s14 = scalar_lea.hbm %s2233_s0, 512 }
  0x38   : > { %p1502_p7 = scmp.ne.s32.totalorder %s2233_s0, %s1501_s14  ;;  %p1503_p9 = pneg %p1800_p5 }
  0x39   : > { %p1508_p10 = scmp.lt.u32.totalorder %s1501_s14, %s2233_s0 }
  0x3a   : > { %p1504_p11 = pnand %p1503_p9, %p1502_p7 }
  0x3c   : > { %p1505_p12 = pneg %p1504_p11 }
  0x3e   : > { %p1510_p0 = pnand %p1508_p10, %p1505_p12 }
  0x40   : > { %1513 = shalt.err (!%p1510_p0)
}
  0x41   : > { %s1514_s6 = scalar_lea.vmem %s1793_s12, 512  ;;  %p1522_p8 = scmp.lt.s32.totalorder %s1793_s12, %s1793_s12 }
  0x42   : > { %p1515_p1 = scmp.ne.s32.totalorder %s1793_s12, %s1514_s6  ;;  %p1523_p2 = scmp.lt.s32.totalorder %s1514_s6, %s1514_s6 }
  0x44   : > { %p1517_p4 = pnand %p1515_p1, %p1503_p9  ;;  %p1524_p3 = por %p1523_p2, %p1522_p8 }
  0x46   : > { %p1518_p13 = pneg %p1517_p4 }
  0x48   : > { %p1525_p6 = pnand %p1524_p3, %p1518_p13 }
  0x4a   : > { %1528 = shalt.err (!%p1525_p6)
}
  0x4b   : > { %s1650_s1 = smov 256   ;;  %s1651_s18 = smov 16  }
  0x4c   : > { %1400 = dma.hbm_to_vmem [thread:$0]  (!%p1800_p5), %s2233_s0, 512, %s1793_s12, [#allocation4], %s1650_s1, %s1650_s1, %s1651_s18  }
  0x4d   : > { %s1529_s11 = scalar_lea.hbm %s1807_s28, 16384  ;;  %p2251_p6 = scmp.ne.s32.totalorder %s2247_s10, 0 }
  0x4e   : > { %p1530_p8 = scmp.ne.s32.totalorder %s1807_s28, %s1529_s11  ;;  %s1534_s26 = scalar_lea.hbm %s2236_s3, 32768 }
  0x4f   : > { %p2252_p13 = pneg %p2251_p6  ;;  %p1535_p7 = scmp.lt.u32.totalorder %s1807_s28, %s2236_s3 }
  0x50   : > { %p1536_p9 = scmp.lt.u32.totalorder %s1534_s26, %s1529_s11  ;;  %p1538_p12 = scmp.lt.u32.totalorder %s1529_s11, %s1807_s28 }
  0x51   : > { %p1532_p2 = pnand %p1530_p8, %p2252_p13 }
  0x52   : > { %p1537_p11 = por %p1536_p9, %p1535_p7 }
  0x53   : > { %p1533_p3 = pneg %p1532_p2 }
  0x54   : > { %p1539_p10 = por %p1538_p12, %p1537_p11 }
  0x56   : > { %p1540_p0 = pnand %p1539_p10, %p1533_p3 }
  0x58   : > { %1543 = shalt.err (!%p1540_p0)
}
  0x59   : > { %s1544_s12 = scalar_lea.vmem %s1810_s7, 16384  ;;  %p2253_p1 = pmov %p2252_p13 }
  0x5a   : > { %p1545_p5 = scmp.ne.s32.totalorder %s1810_s7, %s1544_s12  ;;  %s1652_s25 = smov [#allocation8]  }
  0x5b   : > { %s1549_s29 = sshll.u32 %s1652_s25, 4  ;;  %s1550_s29 = int_to_ptr.vmem [resolvable:$false] %s1549_s29 }
  0x5c   : > { %p1547_p4 = pnand %p1545_p5, %p2253_p1  ;;  %s1551_s8 = scalar_lea.vmem %s1550_s29, 32768 }
  0x5d   : > { %p1552_p13 = scmp.lt.s32.totalorder %s1810_s7, %s1550_s29  ;;  %p1553_p2 = scmp.lt.s32.totalorder %s1551_s8, %s1544_s12 }
  0x5e   : > { %p1548_p8 = pneg %p1547_p4 }
  0x5f   : > { %p1554_p7 = por %p1553_p2, %p1552_p13 }
  0x61   : > { %p1555_p9 = pnand %p1554_p7, %p1548_p8 }
  0x63   : > { %1558 = shalt.err (!%p1555_p9)
}
  0x64   : > { %1407 = dma.hbm_to_vmem [thread:$0]  (!%p2251_p6), %s1807_s28, 16384, %s1810_s7, %s1747_s13, %s1650_s1, %s1650_s1, %s1651_s18  }
  0x65   : > { %p2254_p3 = scmp.ne.s32.totalorder %s2249_s17, 0 }
  0x66   : > { %p2255_p11 = scmp.eq.s32.totalorder (!%p2254_p3), %s1776_s15, 0 }
  0x67   : > { %274 = sbr.rel (%p2254_p3) target bundleno = 734 (0x2de), region = 40 }
  0x6e   : > { %1610 = dma.done.wait (%p2255_p11), [#allocation4], 512   ;;  %p2256_p12 = pmov %p2255_p11 }
  0x6f   : > { %s280_s10 = sand.u32 1, %s1776_s15   ;;  %s282_s11 = sand.u32 1, %s1627_s19  }
  0x70   : > { %1612 = vsyncadd (%p2256_p12), [#allocation4], 4294966784  ;;  %s1113_s14 = sshll.u32 %s282_s11, 10  ;;  %s281_s9 = scalar_lea.sflag [#allocation7], %s280_s10 }
  0x71   : > { %s1871_s26 = scalar_lea.vmem [#allocation6], %s1113_s14  ;;  %p2257_p10 = scmp.ne.s32.totalorder %s2248_s16, 0 }
  0x73   : > { %1614 = dma.done.wait (%p2257_p10), %s281_s9, 32768  }
  0x74   : > { %1616 = vsyncadd (%p2257_p10), %s281_s9, 4294934528  ;;  %s1115_s13 = sshll.u32 %s1635_s21, 2  ;;  %s1884_s1 = scalar_lea.vmem [#allocation8], %s1113_s14 }
  0x75   : > { %p327_p6 = scmp.lt.s32.totalorder %s1115_s13, 7  ;;  %p1116_p0 = scmp.ne.s32.totalorder %s1635_s21, 0 }
  0x76   : > { %v1653_v0 = vmov (!%p1116_p0), 0.0  }
  0x77   : > { %s2266_s13 = smov (!%p327_p6, %s1115_s13), 7  ;;  %336 = sbr.rel (%p1116_p0) target bundleno = 126 (0x7e), region = 56 }
  0x78   : > { %s329_s7 = scalar_lea.vmem %s2235_s2, %s2266_s13  ;;  %337 = vst [vmem:[#allocation2] sm:$0xff] (!%p1116_p0), %v1653_v0  ;;  %338 = vst [vmem:[#allocation2 + $0x8] sm:$0xff] (!%p1116_p0), %v1653_v0 }
  0x79   : > { %339 = vst [vmem:[#allocation2 + $0x10] sm:$0xff] (!%p1116_p0), %v1653_v0  ;;  %340 = vst [vmem:[#allocation2 + $0x18] sm:$0xff] (!%p1116_p0), %v1653_v0 }
  0x7e PF: > { %v346_v1 = vld [vmem:[%s1871_s26 + $0x8] sm:$0xff]  ;;  %v345_v3 = vld [vmem:[%s1871_s26] sm:$0xff]  ;;  %p1117_p5 = scmp.ne.s32.totalorder %s1635_s21, 1 }
  0x7f   : > { %v350_v2 = vld [vmem:[%s1871_s26 + $0x28] sm:$0xff]  ;;  %v349_v5 = vld [vmem:[%s1871_s26 + $0x20] sm:$0xff] }
  0x80   : > { %v1125_v4 = vpack.c.bf16 %v350_v2, %v346_v1  ;;  %v354_v6 = vld [vmem:[%s1871_s26 + $0x48] sm:$0xff]  ;;  %v1127_v8 = vpack.c.bf16 %v349_v5, %v345_v3  ;;  %v353_v10 = vld [vmem:[%s1871_s26 + $0x40] sm:$0xff] }
  0x81   : > { %v358_v7 = vld [vmem:[%s1871_s26 + $0x68] sm:$0xff]  ;;  %v357_v11 = vld [vmem:[%s1871_s26 + $0x60] sm:$0xff] }
  0x82   : > { %v1129_v9 = vpack.c.bf16 %v358_v7, %v354_v6  ;;  %v362_v12 = vld [vmem:[%s1871_s26 + $0x88] sm:$0xff]  ;;  %1126 = vmatprep.subr.bf16.mxu1 %v1125_v4  ;;  %v1131_v14 = vpack.c.bf16 %v357_v11, %v353_v10  ;;  %v361_v16 = vld [vmem:[%s1871_s26 + $0x80] sm:$0xff] }
  0x83   : > { %v366_v13 = vld [vmem:[%s1871_s26 + $0xa8] sm:$0xff]  ;;  %1128 = vmatpush1.bf16.msra.mxu1 %v1127_v8  ;;  %v365_v17 = vld [vmem:[%s1871_s26 + $0xa0] sm:$0xff] }
  0x84   : > { %1130 = vmatprep.subr.bf16.mxu1 %v1129_v9  ;;  %v1133_v15 = vpack.c.bf16 %v366_v13, %v362_v12  ;;  %v370_v18 = vld [vmem:[%s1871_s26 + $0xc8] sm:$0xff]  ;;  %v1135_v20 = vpack.c.bf16 %v365_v17, %v361_v16  ;;  %v369_v22 = vld [vmem:[%s1871_s26 + $0xc0] sm:$0xff]  ;;  %v664_v17 = vld [vmem:[%s1884_s1 + $0x18] sm:$0xff] }
  0x85   : > { %v374_v19 = vld [vmem:[%s1871_s26 + $0xe8] sm:$0xff]  ;;  %v373_v23 = vld [vmem:[%s1871_s26 + $0xe0] sm:$0xff] }
  0x86   : > { %v1137_v21 = vpack.c.bf16 %v374_v19, %v370_v18  ;;  %v378_v24 = vld [vmem:[%s1871_s26 + $0x108] sm:$0xff]  ;;  %v1139_v26 = vpack.c.bf16 %v373_v23, %v369_v22  ;;  %v377_v28 = vld [vmem:[%s1871_s26 + $0x100] sm:$0xff]  ;;  %v668_v23 = vld [vmem:[%s1884_s1 + $0x38] sm:$0xff] }
  0x87   : > { %1132 = vmatpush1.bf16.msra.mxu1 %v1131_v14  ;;  %v382_v25 = vld [vmem:[%s1871_s26 + $0x128] sm:$0xff]  ;;  %v381_v29 = vld [vmem:[%s1871_s26 + $0x120] sm:$0xff] }
  0x88   : > { %1134 = vmatprep.subr.bf16.mxu1 %v1133_v15  ;;  %v1141_v27 = vpack.c.bf16 %v382_v25, %v378_v24  ;;  %v386_v30 = vld [vmem:[%s1871_s26 + $0x148] sm:$0xff]  ;;  %v1143_v32 = vpack.c.bf16 %v381_v29, %v377_v28  ;;  %v385_v34 = vld [vmem:[%s1871_s26 + $0x140] sm:$0xff]  ;;  %v672_v29 = vld [vmem:[%s1884_s1 + $0x58] sm:$0xff] }
  0x89   : > { %v390_v31 = vld [vmem:[%s1871_s26 + $0x168] sm:$0xff]  ;;  %v389_v35 = vld [vmem:[%s1871_s26 + $0x160] sm:$0xff] }
  0x8a   : > { %v1145_v33 = vpack.c.bf16 %v390_v31, %v386_v30  ;;  %v394_v36 = vld [vmem:[%s1871_s26 + $0x188] sm:$0xff]  ;;  %v1147_v38 = vpack.c.bf16 %v389_v35, %v385_v34  ;;  %v393_v40 = vld [vmem:[%s1871_s26 + $0x180] sm:$0xff] }
  0x8b   : > { %1136 = vmatpush1.bf16.msra.mxu1 %v1135_v20  ;;  %v398_v37 = vld [vmem:[%s1871_s26 + $0x1a8] sm:$0xff]  ;;  %v397_v41 = vld [vmem:[%s1871_s26 + $0x1a0] sm:$0xff] }
  0x8c   : > { %1138 = vmatprep.subr.bf16.mxu1 %v1137_v21  ;;  %v1149_v39 = vpack.c.bf16 %v398_v37, %v394_v36  ;;  %v1915_v42 = vld [vmem:[#allocation3 + $0x8] sm:$0xff]  ;;  %v1151_v45 = vpack.c.bf16 %v397_v41, %v393_v40  ;;  %v401_v47 = vld [vmem:[%s1871_s26 + $0x1c0] sm:$0xff]  ;;  %v663_v21 = vld [vmem:[%s1884_s1 + $0x10] sm:$0xff] }
  0x8d   : > { %v402_v43 = vld [vmem:[%s1871_s26 + $0x1c8] sm:$0xff]  ;;  %559 = vmatprep.mubr.f32.mxu1 %v1915_v42  ;;  %v405_v48 = vld [vmem:[%s1871_s26 + $0x1e0] sm:$0xff]  ;;  %v676_v41 = vld [vmem:[%s1884_s1 + $0x78] sm:$0xff] }
  0x8e   : > { %v406_v44 = vld [vmem:[%s1871_s26 + $0x1e8] sm:$0xff]  ;;  %v1155_v51 = vpack.c.bf16 %v405_v48, %v401_v47  ;;  %v409_v53 = vld [vmem:[%s1871_s26 + $0x200] sm:$0xff] }
  0x8f   : > { %1140 = vmatpush1.bf16.msra.mxu1 %v1139_v26  ;;  %v1153_v46 = vpack.c.bf16 %v406_v44, %v402_v43  ;;  %v410_v49 = vld [vmem:[%s1871_s26 + $0x208] sm:$0xff]  ;;  %v413_v54 = vld [vmem:[%s1871_s26 + $0x220] sm:$0xff] }
  0x90   : > { %1142 = vmatprep.subr.bf16.mxu1 %v1141_v27  ;;  %v414_v50 = vld [vmem:[%s1871_s26 + $0x228] sm:$0xff]  ;;  %v1159_v57 = vpack.c.bf16 %v413_v54, %v409_v53  ;;  %v417_v59 = vld [vmem:[%s1871_s26 + $0x240] sm:$0xff]  ;;  %v667_v27 = vld [vmem:[%s1884_s1 + $0x30] sm:$0xff] }
  0x91   : > { %v1157_v52 = vpack.c.bf16 %v414_v50, %v410_v49  ;;  %v418_v55 = vld [vmem:[%s1871_s26 + $0x248] sm:$0xff]  ;;  %v421_v60 = vld [vmem:[%s1871_s26 + $0x260] sm:$0xff]  ;;  %v680_v54 = vld [vmem:[%s1884_s1 + $0x98] sm:$0xff] }
  0x92   : > { %v422_v56 = vld [vmem:[%s1871_s26 + $0x268] sm:$0xff]  ;;  %v1163_v63 = vpack.c.bf16 %v421_v60, %v417_v59  ;;  %v425_v1 = vld [vmem:[%s1871_s26 + $0x280] sm:$0xff]  ;;  %v348_v60 = vld [vmem:[%s1871_s26 + $0x18] sm:$0xff] }
  0x93   : > { %1144 = vmatpush1.bf16.msra.mxu1 %v1143_v32  ;;  %v1161_v58 = vpack.c.bf16 %v422_v56, %v418_v55  ;;  %v426_v61 = vld [vmem:[%s1871_s26 + $0x288] sm:$0xff]  ;;  %v429_v2 = vld [vmem:[%s1871_s26 + $0x2a0] sm:$0xff] }
  0x94   : > { %1146 = vmatprep.subr.bf16.mxu1 %v1145_v33  ;;  %v430_v62 = vld [vmem:[%s1871_s26 + $0x2a8] sm:$0xff]  ;;  %v1167_v5 = vpack.c.bf16 %v429_v2, %v425_v1  ;;  %v433_v7 = vld [vmem:[%s1871_s26 + $0x2c0] sm:$0xff]  ;;  %v684_v2 = vld [vmem:[%s1884_s1 + $0xb8] sm:$0xff] }
  0x95   : > { %v1165_v0 = vpack.c.bf16 %v430_v62, %v426_v61  ;;  %v434_v3 = vld [vmem:[%s1871_s26 + $0x2c8] sm:$0xff]  ;;  %v437_v8 = vld [vmem:[%s1871_s26 + $0x2e0] sm:$0xff] }
  0x96   : > { %v438_v4 = vld [vmem:[%s1871_s26 + $0x2e8] sm:$0xff]  ;;  %v441_v11 = vld [vmem:[%s1871_s26 + $0x300] sm:$0xff]  ;;  %v1171_v13 = vpack.c.bf16 %v437_v8, %v433_v7  ;;  %v351_v7 = vld [vmem:[%s1871_s26 + $0x30] sm:$0xff] }
  0x97   : > { %1148 = vmatpush1.bf16.msra.mxu1 %v1147_v38  ;;  %v1169_v6 = vpack.c.bf16 %v438_v4, %v434_v3  ;;  %v442_v9 = vld [vmem:[%s1871_s26 + $0x308] sm:$0xff]  ;;  %v445_v12 = vld [vmem:[%s1871_s26 + $0x320] sm:$0xff]  ;;  %v671_v38 = vld [vmem:[%s1884_s1 + $0x50] sm:$0xff] }
  0x98   : > { %1150 = vmatprep.subr.bf16.mxu1 %v1149_v39  ;;  %v446_v10 = vld [vmem:[%s1871_s26 + $0x328] sm:$0xff]  ;;  %v661_v18 = vld [vmem:[%s1884_s1] sm:$0xff]  ;;  %v1175_v30 = vpack.c.bf16 %v445_v12, %v441_v11  ;;  %v356_v8 = vld [vmem:[%s1871_s26 + $0x58] sm:$0xff] }
  0x99   : > { %v450_v14 = vld [vmem:[%s1871_s26 + $0x348] sm:$0xff]  ;;  %v1173_v19 = vpack.c.bf16 %v446_v10, %v442_v9  ;;  %v1255_v24 = vpack.c.bf16 %v663_v21, %v661_v18  ;;  %v665_v26 = vld [vmem:[%s1884_s1 + $0x20] sm:$0xff]  ;;  %v360_v10 = vld [vmem:[%s1871_s26 + $0x78] sm:$0xff] }
  0x9a   : > { %v454_v15 = vld [vmem:[%s1871_s26 + $0x368] sm:$0xff]  ;;  %v449_v31 = vld [vmem:[%s1871_s26 + $0x340] sm:$0xff]  ;;  %v1259_v33 = vpack.c.bf16 %v667_v27, %v665_v26  ;;  %v683_v12 = vld [vmem:[%s1884_s1 + $0xb0] sm:$0xff]  ;;  %v1193_v18 = vpack.c.bf16 %v360_v10, %v356_v8 }
  0x9b   : > { %1152 = vmatpush1.bf16.msra.mxu1 %v1151_v45  ;;  %v662_v16 = vld [vmem:[%s1884_s1 + $0x8] sm:$0xff]  ;;  %v453_v32 = vld [vmem:[%s1871_s26 + $0x360] sm:$0xff]  ;;  %v1177_v34 = vpack.c.bf16 %v454_v15, %v450_v14  ;;  %v688_v14 = vld [vmem:[%s1884_s1 + $0xd8] sm:$0xff] }
  0x9c   : > { %1154 = vmatprep.subr.bf16.mxu1 %v1153_v46  ;;  %v1253_v20 = vpack.c.bf16 %v664_v17, %v662_v16  ;;  %v666_v22 = vld [vmem:[%s1884_s1 + $0x28] sm:$0xff]  ;;  %v669_v37 = vld [vmem:[%s1884_s1 + $0x40] sm:$0xff]  ;;  %v1179_v43 = vpack.c.bf16 %v453_v32, %v449_v31  ;;  %v355_v17 = vld [vmem:[%s1871_s26 + $0x50] sm:$0xff] }
  0x9d   : > { %v1257_v25 = vpack.c.bf16 %v668_v23, %v666_v22  ;;  %v670_v28 = vld [vmem:[%s1884_s1 + $0x48] sm:$0xff]  ;;  %v457_v44 = vld [vmem:[%s1871_s26 + $0x380] sm:$0xff]  ;;  %v1263_v46 = vpack.c.bf16 %v671_v38, %v669_v37  ;;  %v1991_v21 = vld [vmem:[#allocation3 + $0x18] sm:$0xff] }
  0x9e   : > { %1254 = vmatprep.subr.bf16.mxu0 %v1253_v20  ;;  %v458_v35 = vld [vmem:[%s1871_s26 + $0x388] sm:$0xff]  ;;  %v1261_v36 = vpack.c.bf16 %v672_v29, %v670_v28  ;;  %v461_v45 = vld [vmem:[%s1871_s26 + $0x3a0] sm:$0xff]  ;;  %v364_v20 = vld [vmem:[%s1871_s26 + $0x98] sm:$0xff] }
  0x9f   : > { %1156 = vmatpush1.bf16.msra.mxu1 %v1155_v51  ;;  %1256 = vmatpush1.bf16.msra.mxu0 %v1255_v24  ;;  %v462_v39 = vld [vmem:[%s1871_s26 + $0x3a8] sm:$0xff]  ;;  %v673_v50 = vld [vmem:[%s1884_s1 + $0x60] sm:$0xff]  ;;  %v675_v51 = vld [vmem:[%s1884_s1 + $0x70] sm:$0xff]  ;;  %v1183_v55 = vpack.c.bf16 %v461_v45, %v457_v44 }
  0xa0   : > { %1158 = vmatprep.subr.bf16.mxu1 %v1157_v52  ;;  %1258 = vmatprep.subr.bf16.mxu0 %v1257_v25  ;;  %v674_v40 = vld [vmem:[%s1884_s1 + $0x68] sm:$0xff]  ;;  %v1181_v47 = vpack.c.bf16 %v462_v39, %v458_v35  ;;  %v465_v56 = vld [vmem:[%s1871_s26 + $0x3c0] sm:$0xff]  ;;  %v368_v23 = vld [vmem:[%s1871_s26 + $0xb8] sm:$0xff] }
  0xa1   : > { %v466_v48 = vld [vmem:[%s1871_s26 + $0x3c8] sm:$0xff]  ;;  %v1265_v49 = vpack.c.bf16 %v676_v41, %v674_v40  ;;  %v677_v62 = vld [vmem:[%s1884_s1 + $0x80] sm:$0xff]  ;;  %v687_v26 = vld [vmem:[%s1884_s1 + $0xd0] sm:$0xff]  ;;  %v1197_v31 = vpack.c.bf16 %v368_v23, %v364_v20 }
  0xa2   : > { %v470_v52 = vld [vmem:[%s1871_s26 + $0x3e8] sm:$0xff]  ;;  %v681_v11 = vld [vmem:[%s1884_s1 + $0xa0] sm:$0xff]  ;;  %v692_v28 = vld [vmem:[%s1884_s1 + $0xf8] sm:$0xff] }
  0xa3   : > { %1160 = vmatpush1.bf16.msra.mxu1 %v1159_v57  ;;  %1260 = vmatpush1.bf16.msra.mxu0 %v1259_v33  ;;  %v678_v53 = vld [vmem:[%s1884_s1 + $0x88] sm:$0xff]  ;;  %v469_v57 = vld [vmem:[%s1871_s26 + $0x3e0] sm:$0xff]  ;;  %v1185_v59 = vpack.c.bf16 %v470_v52, %v466_v48  ;;  %v1275_v22 = vpack.c.bf16 %v683_v12, %v681_v11  ;;  %v363_v32 = vld [vmem:[%s1871_s26 + $0x90] sm:$0xff] }
  0xa4   : > { %1162 = vmatprep.subr.bf16.mxu1 %v1161_v58  ;;  %1262 = vmatprep.subr.bf16.mxu0 %v1261_v36  ;;  %v1267_v58 = vpack.c.bf16 %v675_v51, %v673_v50  ;;  %v1269_v61 = vpack.c.bf16 %v680_v54, %v678_v53  ;;  %v682_v1 = vld [vmem:[%s1884_s1 + $0xa8] sm:$0xff]  ;;  %v1187_v3 = vpack.c.bf16 %v469_v57, %v465_v56  ;;  %v1986_v15 = vld [vmem:[#allocation3] sm:$0xff]  ;;  %v367_v33 = vld [vmem:[%s1871_s26 + $0xb0] sm:$0xff] }
  0xa5   : > { %v1273_v9 = vpack.c.bf16 %v684_v2, %v682_v1  ;;  %v685_v25 = vld [vmem:[%s1884_s1 + $0xc0] sm:$0xff]  ;;  %v690_v27 = vld [vmem:[%s1884_s1 + $0xe8] sm:$0xff]  ;;  %v376_v36 = vld [vmem:[%s1871_s26 + $0xf8] sm:$0xff] }
  0xa6   : > { %v1279_v35 = vpack.c.bf16 %v687_v26, %v685_v25  ;;  %v1281_v37 = vpack.c.bf16 %v692_v28, %v690_v27  ;;  %v689_v38 = vld [vmem:[%s1884_s1 + $0xe0] sm:$0xff]  ;;  %v691_v39 = vld [vmem:[%s1884_s1 + $0xf0] sm:$0xff]  ;;  %v694_v40 = vld [vmem:[%s1884_s1 + $0x108] sm:$0xff] }
  0xa7   : > { %1164 = vmatpush1.bf16.msra.mxu1 %v1163_v63  ;;  %1264 = vmatpush1.bf16.msra.mxu0 %v1263_v46  ;;  %v679_v63 = vld [vmem:[%s1884_s1 + $0x90] sm:$0xff]  ;;  %v696_v41 = vld [vmem:[%s1884_s1 + $0x118] sm:$0xff]  ;;  %v1283_v48 = vpack.c.bf16 %v691_v39, %v689_v38  ;;  %v693_v51 = vld [vmem:[%s1884_s1 + $0x100] sm:$0xff] }
  0xa8   : > { %1166 = vmatprep.subr.bf16.mxu1 %v1165_v0  ;;  %1266 = vmatprep.subr.bf16.mxu0 %v1265_v49  ;;  %v352_v0 = vld [vmem:[%s1871_s26 + $0x38] sm:$0xff]  ;;  %v1271_v4 = vpack.c.bf16 %v679_v63, %v677_v62  ;;  %v371_v45 = vld [vmem:[%s1871_s26 + $0xd0] sm:$0xff]  ;;  %v1285_v50 = vpack.c.bf16 %v696_v41, %v694_v40  ;;  %v698_v53 = vld [vmem:[%s1884_s1 + $0x128] sm:$0xff] }
  0xa9   : > { %v375_v46 = vld [vmem:[%s1871_s26 + $0xf0] sm:$0xff]  ;;  %v384_v49 = vld [vmem:[%s1871_s26 + $0x138] sm:$0xff]  ;;  %v697_v63 = vld [vmem:[%s1884_s1 + $0x120] sm:$0xff] }
  0xaa   : > { %v695_v52 = vld [vmem:[%s1884_s1 + $0x110] sm:$0xff]  ;;  %v700_v54 = vld [vmem:[%s1884_s1 + $0x138] sm:$0xff]  ;;  %v702_v1 = vld [vmem:[%s1884_s1 + $0x148] sm:$0xff] }
  0xab   : > { %1168 = vmatpush1.bf16.msra.mxu1 %v1167_v5  ;;  %1268 = vmatpush1.bf16.msra.mxu0 %v1267_v58  ;;  %v1189_v5 = vpack.c.bf16 %v352_v0, %v348_v60  ;;  %v379_v57 = vld [vmem:[%s1871_s26 + $0x110] sm:$0xff]  ;;  %v1287_v60 = vpack.c.bf16 %v695_v52, %v693_v51  ;;  %v1289_v62 = vpack.c.bf16 %v700_v54, %v698_v53  ;;  %v704_v2 = vld [vmem:[%s1884_s1 + $0x158] sm:$0xff]  ;;  %v701_v11 = vld [vmem:[%s1884_s1 + $0x140] sm:$0xff] }
  0xac   : > { %1170 = vmatprep.subr.bf16.mxu1 %v1169_v6  ;;  %v347_v6 = vld [vmem:[%s1871_s26 + $0x10] sm:$0xff]  ;;  %1270 = vmatprep.subr.bf16.mxu0 %v1269_v61  ;;  %v392_v61 = vld [vmem:[%s1871_s26 + $0x178] sm:$0xff]  ;;  %v1293_v10 = vpack.c.bf16 %v704_v2, %v702_v1  ;;  %v705_v25 = vld [vmem:[%s1884_s1 + $0x160] sm:$0xff] }
  0xad   : > { %v1191_v16 = vpack.c.bf16 %v351_v7, %v347_v6  ;;  %v383_v58 = vld [vmem:[%s1871_s26 + $0x130] sm:$0xff]  ;;  %v396_v7 = vld [vmem:[%s1871_s26 + $0x198] sm:$0xff]  ;;  %v710_v27 = vld [vmem:[%s1884_s1 + $0x188] sm:$0xff] }
  0xae   : > { %v699_v0 = vld [vmem:[%s1884_s1 + $0x130] sm:$0xff]  ;;  %v404_v20 = vld [vmem:[%s1871_s26 + $0x1d8] sm:$0xff]  ;;  %v709_v38 = vld [vmem:[%s1884_s1 + $0x180] sm:$0xff] }
  0xaf   : > { %1172 = vmatpush1.bf16.msra.mxu1 %v1171_v13  ;;  %v686_v13 = vld [vmem:[%s1884_s1 + $0xc8] sm:$0xff]  ;;  %1272 = vmatpush1.bf16.msra.mxu0 %v1271_v4  ;;  %v391_v6 = vld [vmem:[%s1871_s26 + $0x170] sm:$0xff]  ;;  %v1291_v8 = vpack.c.bf16 %v699_v0, %v697_v63  ;;  %v408_v23 = vld [vmem:[%s1871_s26 + $0x1f8] sm:$0xff] }
  0xb0   : > { %1174 = vmatprep.subr.bf16.mxu1 %v1173_v19  ;;  %v359_v19 = vld [vmem:[%s1871_s26 + $0x70] sm:$0xff]  ;;  %1274 = vmatprep.subr.bf16.mxu0 %v1273_v9  ;;  %v1277_v24 = vpack.c.bf16 %v688_v14, %v686_v13  ;;  %v400_v9 = vld [vmem:[%s1871_s26 + $0x1b8] sm:$0xff]  ;;  %v706_v13 = vld [vmem:[%s1884_s1 + $0x168] sm:$0xff] }
  0xb1   : > { %v1195_v29 = vpack.c.bf16 %v359_v19, %v355_v17  ;;  %v703_v12 = vld [vmem:[%s1884_s1 + $0x150] sm:$0xff]  ;;  %v708_v14 = vld [vmem:[%s1884_s1 + $0x178] sm:$0xff]  ;;  %v1213_v17 = vpack.c.bf16 %v400_v9, %v396_v7  ;;  %v714_v40 = vld [vmem:[%s1884_s1 + $0x1a8] sm:$0xff] }
  0xb2   : > { %v399_v19 = vld [vmem:[%s1871_s26 + $0x1b0] sm:$0xff]  ;;  %v712_v28 = vld [vmem:[%s1884_s1 + $0x198] sm:$0xff]  ;;  %v713_v51 = vld [vmem:[%s1884_s1 + $0x1a0] sm:$0xff] }
  0xb3   : > { %1176 = vmatpush1.bf16.msra.mxu1 %v1175_v30  ;;  %v2000_v30 = vld [vmem:[#allocation3 + $0x10] sm:$0xff]  ;;  %1276 = vmatpush1.bf16.msra.mxu0 %v1275_v22  ;;  %v1295_v22 = vpack.c.bf16 %v703_v12, %v701_v11  ;;  %v716_v41 = vld [vmem:[%s1884_s1 + $0x1b8] sm:$0xff]  ;;  %v718_v53 = vld [vmem:[%s1884_s1 + $0x1c8] sm:$0xff] }
  0xb4   : > { %1178 = vmatprep.subr.bf16.mxu1 %v1177_v34  ;;  %v372_v34 = vld [vmem:[%s1871_s26 + $0xd8] sm:$0xff]  ;;  %1278 = vmatprep.subr.bf16.mxu0 %v1277_v24  ;;  %v1297_v24 = vpack.c.bf16 %v708_v14, %v706_v13  ;;  %v707_v26 = vld [vmem:[%s1884_s1 + $0x170] sm:$0xff] }
  0xb5   : > { %v1201_v44 = vpack.c.bf16 %v376_v36, %v372_v34  ;;  %v412_v34 = vld [vmem:[%s1871_s26 + $0x218] sm:$0xff]  ;;  %v711_v39 = vld [vmem:[%s1884_s1 + $0x190] sm:$0xff] }
  0xb6   : > { %v416_v36 = vld [vmem:[%s1871_s26 + $0x238] sm:$0xff]  ;;  %v715_v52 = vld [vmem:[%s1884_s1 + $0x1b0] sm:$0xff] }
  0xb7   : > { %1180 = vmatpush1.bf16.msra.mxu1 %v1179_v43  ;;  %v1199_v43 = vpack.c.bf16 %v367_v33, %v363_v32  ;;  %1280 = vmatpush1.bf16.msra.mxu0 %v1279_v35  ;;  %v403_v32 = vld [vmem:[%s1871_s26 + $0x1d0] sm:$0xff]  ;;  %v1299_v35 = vpack.c.bf16 %v707_v26, %v705_v25  ;;  %v720_v54 = vld [vmem:[%s1884_s1 + $0x1d8] sm:$0xff] }
  0xb8   : > { %1182 = vmatprep.subr.bf16.mxu1 %v1181_v47  ;;  %v380_v47 = vld [vmem:[%s1871_s26 + $0x118] sm:$0xff]  ;;  %1282 = vmatprep.subr.bf16.mxu0 %v1281_v37  ;;  %v407_v33 = vld [vmem:[%s1871_s26 + $0x1f0] sm:$0xff]  ;;  %v1301_v37 = vpack.c.bf16 %v712_v28, %v710_v27 }
  0xb9   : > { %v1205_v56 = vpack.c.bf16 %v384_v49, %v380_v47  ;;  %v420_v47 = vld [vmem:[%s1871_s26 + $0x258] sm:$0xff]  ;;  %v427_v1 = vld [vmem:[%s1871_s26 + $0x290] sm:$0xff] }
  0xba   : > { %v424_v49 = vld [vmem:[%s1871_s26 + $0x278] sm:$0xff]  ;;  %v431_v2 = vld [vmem:[%s1871_s26 + $0x2b0] sm:$0xff] }
  0xbb   : > { %1184 = vmatpush1.bf16.msra.mxu1 %v1183_v55  ;;  %v1203_v55 = vpack.c.bf16 %v375_v46, %v371_v45  ;;  %1284 = vmatpush1.bf16.msra.mxu0 %v1283_v48  ;;  %v411_v45 = vld [vmem:[%s1871_s26 + $0x210] sm:$0xff]  ;;  %v1303_v48 = vpack.c.bf16 %v711_v39, %v709_v38  ;;  %v444_v9 = vld [vmem:[%s1871_s26 + $0x318] sm:$0xff] }
  0xbc   : > { %1186 = vmatprep.subr.bf16.mxu1 %v1185_v59  ;;  %v388_v59 = vld [vmem:[%s1871_s26 + $0x158] sm:$0xff]  ;;  %1286 = vmatprep.subr.bf16.mxu0 %v1285_v50  ;;  %v415_v46 = vld [vmem:[%s1871_s26 + $0x230] sm:$0xff]  ;;  %v1305_v50 = vpack.c.bf16 %v716_v41, %v714_v40  ;;  %v722_v40 = vld [vmem:[%s1884_s1 + $0x1e8] sm:$0xff] }
  0xbd   : > { %v1209_v4 = vpack.c.bf16 %v392_v61, %v388_v59  ;;  %v1307_v59 = vpack.c.bf16 %v715_v52, %v713_v51  ;;  %v432_v61 = vld [vmem:[%s1871_s26 + $0x2b8] sm:$0xff]  ;;  %v435_v7 = vld [vmem:[%s1871_s26 + $0x2d0] sm:$0xff] }
  0xbe   : > { %v443_v13 = vld [vmem:[%s1871_s26 + $0x310] sm:$0xff]  ;;  %v724_v41 = vld [vmem:[%s1884_s1 + $0x1f8] sm:$0xff] }
  0xbf   : > { %1188 = vmatpush1.bf16.msra.mxu1 %v1187_v3  ;;  %v1207_v3 = vpack.c.bf16 %v383_v58, %v379_v57  ;;  %1288 = vmatpush1.bf16.msra.mxu0 %v1287_v60  ;;  %v419_v57 = vld [vmem:[%s1871_s26 + $0x250] sm:$0xff]  ;;  %v428_v60 = vld [vmem:[%s1871_s26 + $0x298] sm:$0xff] }
  0xc0   : > { %1190 = vmatprep.subr.bf16.mxu1 %v1189_v5  ;;  %v387_v5 = vld [vmem:[%s1871_s26 + $0x150] sm:$0xff]  ;;  %1290 = vmatprep.subr.bf16.mxu0 %v1289_v62  ;;  %v1309_v62 = vpack.c.bf16 %v720_v54, %v718_v53  ;;  %v1229_v0 = vpack.c.bf16 %v432_v61, %v428_v60  ;;  %v2105_v53 = vld [vmem:[%s329_s7] sm:$0xf] }
  0xc1   : > { %v423_v58 = vld [vmem:[%s1871_s26 + $0x270] sm:$0xff]  ;;  %v725_v60 = vld [vmem:[%s1884_s1 + $0x200] sm:$0xff] }
  0xc2   : > { %560 = vmatmul.mubr.f32.vlgmr.msra.gmra.mrb[0].mxu1 %v1986_v15  ;;  %v1227_v63 = vpack.c.bf16 %v423_v58, %v419_v57  ;;  %v447_v14 = vld [vmem:[%s1871_s26 + $0x330] sm:$0xff] }
  0xc3   : > { %1192 = vmatpush1.bf16.msra.mxu1 %v1191_v16  ;;  %565 = vmatprep.mubr.f32.mxu1 %v1991_v21  ;;  %v1211_v16 = vpack.c.bf16 %v391_v6, %v387_v5  ;;  %v1231_v5 = vpack.c.bf16 %v431_v2, %v427_v1  ;;  %v459_v27 = vld [vmem:[%s1871_s26 + $0x390] sm:$0xff] }
  0xc4   : > { %1194 = vmatprep.subr.bf16.mxu1 %v1193_v18  ;;  %v395_v18 = vld [vmem:[%s1871_s26 + $0x190] sm:$0xff]  ;;  %1292 = vmatpush1.bf16.msra.mxu0 %v1291_v8 }
  0xc5   : > { %1294 = vmatprep.subr.bf16.mxu0 %v1293_v10  ;;  %v439_v8 = vld [vmem:[%s1871_s26 + $0x2f0] sm:$0xff]  ;;  %v448_v10 = vld [vmem:[%s1871_s26 + $0x338] sm:$0xff] }
  0xc6   : > { %566 = vmatmul.mubr.f32.gmra.mrb[2].mxu1 %v2000_v30  ;;  %v1235_v11 = vpack.c.bf16 %v439_v8, %v435_v7  ;;  %v1237_v12 = vpack.c.bf16 %v448_v10, %v444_v9  ;;  %v463_v28 = vld [vmem:[%s1871_s26 + $0x3b0] sm:$0xff]  ;;  %v734_v10 = vld [vmem:[%s1884_s1 + $0x248] sm:$0xff] }
  0xc7   : > { %1196 = vmatpush1.bf16.msra.mxu1 %v1195_v29  ;;  %636 = vmatprep.mubr.f32.mxu1 %v1915_v42  ;;  %v1215_v29 = vpack.c.bf16 %v399_v19, %v395_v18  ;;  %v1239_v18 = vpack.c.bf16 %v447_v14, %v443_v13  ;;  %v719_v38 = vld [vmem:[%s1884_s1 + $0x1d0] sm:$0xff] }
  0xc8   : > { %1198 = vmatprep.subr.bf16.mxu1 %v1197_v31  ;;  %v1217_v31 = vpack.c.bf16 %v408_v23, %v404_v20  ;;  %1296 = vmatpush1.bf16.msra.mxu0 %v1295_v22  ;;  %v451_v20 = vld [vmem:[%s1871_s26 + $0x350] sm:$0xff]  ;;  %v460_v23 = vld [vmem:[%s1871_s26 + $0x398] sm:$0xff] }
  0xc9   : > { %1298 = vmatprep.subr.bf16.mxu0 %v1297_v24  ;;  %v455_v22 = vld [vmem:[%s1871_s26 + $0x370] sm:$0xff]  ;;  %v464_v24 = vld [vmem:[%s1871_s26 + $0x3b8] sm:$0xff] }
  0xca   : > { %v1243_v25 = vpack.c.bf16 %v455_v22, %v451_v20  ;;  %v1245_v26 = vpack.c.bf16 %v464_v24, %v460_v23  ;;  %v727_v61 = vld [vmem:[%s1884_s1 + $0x210] sm:$0xff]  ;;  %v738_v20 = vld [vmem:[%s1884_s1 + $0x268] sm:$0xff]  ;;  %v740_v22 = vld [vmem:[%s1884_s1 + $0x278] sm:$0xff] }
  0xcb   : > { %1200 = vmatpush1.bf16.msra.mxu1 %v1199_v43  ;;  %v1219_v43 = vpack.c.bf16 %v407_v33, %v403_v32  ;;  %v1247_v32 = vpack.c.bf16 %v463_v28, %v459_v27  ;;  %v731_v7 = vld [vmem:[%s1884_s1 + $0x230] sm:$0xff]  ;;  %v1329_v24 = vpack.c.bf16 %v740_v22, %v738_v20  ;;  %v742_v27 = vld [vmem:[%s1884_s1 + $0x288] sm:$0xff]  ;;  %v744_v28 = vld [vmem:[%s1884_s1 + $0x298] sm:$0xff] }
  0xcc   : > { %1202 = vmatprep.subr.bf16.mxu1 %v1201_v44  ;;  %v1221_v44 = vpack.c.bf16 %v416_v36, %v412_v34  ;;  %1300 = vmatpush1.bf16.msra.mxu0 %v1299_v35  ;;  %v467_v34 = vld [vmem:[%s1871_s26 + $0x3d0] sm:$0xff] }
  0xcd   : > { %1302 = vmatprep.subr.bf16.mxu0 %v1301_v37  ;;  %v471_v35 = vld [vmem:[%s1871_s26 + $0x3f0] sm:$0xff]  ;;  %v717_v37 = vld [vmem:[%s1884_s1 + $0x1c0] sm:$0xff] }
  0xce   : > { %v1251_v36 = vpack.c.bf16 %v471_v35, %v467_v34  ;;  %v1311_v39 = vpack.c.bf16 %v719_v38, %v717_v37  ;;  %v746_v34 = vld [vmem:[%s1884_s1 + $0x2a8] sm:$0xff]  ;;  %v748_v35 = vld [vmem:[%s1884_s1 + $0x2b8] sm:$0xff]  ;;  %v745_v38 = vld [vmem:[%s1884_s1 + $0x2a0] sm:$0xff] }
  0xcf   : > { %1204 = vmatpush1.bf16.msra.mxu1 %v1203_v55  ;;  %v1223_v55 = vpack.c.bf16 %v415_v46, %v411_v45  ;;  %v723_v45 = vld [vmem:[%s1884_s1 + $0x1f0] sm:$0xff]  ;;  %v1337_v37 = vpack.c.bf16 %v748_v35, %v746_v34 }
  0xd0   : > { %1206 = vmatprep.subr.bf16.mxu1 %v1205_v56  ;;  %v1225_v56 = vpack.c.bf16 %v424_v49, %v420_v47  ;;  %1304 = vmatpush1.bf16.msra.mxu0 %v1303_v48  ;;  %v726_v47 = vld [vmem:[%s1884_s1 + $0x208] sm:$0xff]  ;;  %v728_v48 = vld [vmem:[%s1884_s1 + $0x218] sm:$0xff] }
  0xd1   : > { %1306 = vmatprep.subr.bf16.mxu0 %v1305_v50  ;;  %v1317_v49 = vpack.c.bf16 %v728_v48, %v726_v47  ;;  %v475_v50 = vlaneseq  ;;  %v754_v47 = vld [vmem:[%s1884_s1 + $0x2e8] sm:$0xff]  ;;  %v756_v48 = vld [vmem:[%s1884_s1 + $0x2f8] sm:$0xff] }
  0xd3   : > { %1208 = vmatpush1.bf16.msra.mxu1 %v1207_v3  ;;  %v436_v3 = vld [vmem:[%s1871_s26 + $0x2d8] sm:$0xff]  ;;  %v2097_v51 = vshrl.u32 %v475_v50, 7  ;;  %v1345_v50 = vpack.c.bf16 %v756_v48, %v754_v47  ;;  %v787_v47 = vld [vmem:[%s1884_s1 + $0x3f0] sm:$0xff] }
  0xd4   : > { %1210 = vmatprep.subr.bf16.mxu1 %v1209_v4  ;;  %1308 = vmatpush1.bf16.msra.mxu0 %v1307_v59  ;;  %v440_v4 = vld [vmem:[%s1871_s26 + $0x2f8] sm:$0xff] }
  0xd5   : > { %1310 = vmatprep.subr.bf16.mxu0 %v1309_v62  ;;  %v1233_v6 = vpack.c.bf16 %v440_v4, %v436_v3  ;;  %v477_v52 = vsub.s32 0, %v2097_v51  ;;  %v481_v54 = vsub.s32 1, %v2097_v51  ;;  %v1319_v3 = vpack.c.bf16 %v727_v61, %v725_v60  ;;  %v757_v61 = vld [vmem:[%s1884_s1 + $0x300] sm:$0xff] }
  0xd7   : > { %1212 = vmatpush1.bf16.msra.mxu1 %v1211_v16  ;;  %v452_v16 = vld [vmem:[%s1871_s26 + $0x358] sm:$0xff] }
  0xd8   : > { %1214 = vmatprep.subr.bf16.mxu1 %v1213_v17  ;;  %v456_v17 = vld [vmem:[%s1871_s26 + $0x378] sm:$0xff]  ;;  %1312 = vmatpush1.bf16.msra.mxu0 %v1311_v39  ;;  %v747_v39 = vld [vmem:[%s1884_s1 + $0x2b0] sm:$0xff] }
  0xd9   : > { %v1241_v19 = vpack.c.bf16 %v456_v17, %v452_v16 }
  0xdb   : > { %1216 = vmatpush1.bf16.msra.mxu1 %v1215_v29  ;;  %v468_v29 = vld [vmem:[%s1871_s26 + $0x3d8] sm:$0xff] }
  0xdc   : > { %1218 = vmatprep.subr.bf16.mxu1 %v1217_v31  ;;  %v472_v31 = vld [vmem:[%s1871_s26 + $0x3f8] sm:$0xff] }
  0xdd   : > { %v1249_v33 = vpack.c.bf16 %v472_v31, %v468_v29  ;;  %v1333_v31 = vpack.c.bf16 %v744_v28, %v742_v27 }
  0xdf   : > { %1220 = vmatpush1.bf16.msra.mxu1 %v1219_v43  ;;  %v1313_v43 = vpack.c.bf16 %v724_v41, %v722_v40  ;;  %v750_v40 = vld [vmem:[%s1884_s1 + $0x2c8] sm:$0xff]  ;;  %v752_v41 = vld [vmem:[%s1884_s1 + $0x2d8] sm:$0xff] }
  0xe0   : > { %1222 = vmatprep.subr.bf16.mxu1 %v1221_v44  ;;  %v721_v44 = vld [vmem:[%s1884_s1 + $0x1e0] sm:$0xff] }
  0xe1   : > { %v1315_v46 = vpack.c.bf16 %v723_v45, %v721_v44  ;;  %1314 = vmatprep.subr.bf16.mxu0 %v1313_v43  ;;  %v1339_v43 = vpack.c.bf16 %v747_v39, %v745_v38  ;;  %v1341_v44 = vpack.c.bf16 %v752_v41, %v750_v40  ;;  %v749_v45 = vld [vmem:[%s1884_s1 + $0x2c0] sm:$0xff]  ;;  %v783_v38 = vld [vmem:[%s1884_s1 + $0x3d0] sm:$0xff]  ;;  %v489_v39 = vsub.s32 3, %v2097_v51  ;;  %v786_v40 = vld [vmem:[%s1884_s1 + $0x3e8] sm:$0xff] }
  0xe2   : > { %v788_v41 = vld [vmem:[%s1884_s1 + $0x3f8] sm:$0xff] }
  0xe3   : > { %1224 = vmatpush1.bf16.msra.mxu1 %v1223_v55  ;;  %1316 = vmatpush1.bf16.msra.mxu0 %v1315_v46  ;;  %v478_v55 = vrot.slane %v2105_v53, %v477_v52  ;;  %v751_v46 = vld [vmem:[%s1884_s1 + $0x2d0] sm:$0xff]  ;;  %v490_v48 = vrot.slane %v2105_v53, %v489_v39 }
  0xe4   : > { %1226 = vmatprep.subr.bf16.mxu1 %v1225_v56  ;;  %1318 = vmatprep.subr.bf16.mxu0 %v1317_v49  ;;  %v482_v56 = vrot.slane %v2105_v53, %v481_v54  ;;  %v1343_v49 = vpack.c.bf16 %v751_v46, %v749_v45  ;;  %v1377_v45 = vpack.c.bf16 %v788_v41, %v786_v40  ;;  %v785_v46 = vld [vmem:[%s1884_s1 + $0x3e0] sm:$0xff] }
  0xe7   : > { %1228 = vmatpush1.bf16.msra.mxu1 %v1227_v63  ;;  %v730_v63 = vld [vmem:[%s1884_s1 + $0x228] sm:$0xff] }
  0xe8   : > { %1230 = vmatprep.subr.bf16.mxu1 %v1229_v0  ;;  %v732_v0 = vld [vmem:[%s1884_s1 + $0x238] sm:$0xff] }
  0xeb   : > { %1232 = vmatpush1.bf16.msra.mxu1 %v1231_v5  ;;  %v1321_v5 = vpack.c.bf16 %v732_v0, %v730_v63  ;;  %v762_v63 = vld [vmem:[%s1884_s1 + $0x328] sm:$0xff]  ;;  %v764_v0 = vld [vmem:[%s1884_s1 + $0x338] sm:$0xff] }
  0xec   : > { %1234 = vmatprep.subr.bf16.mxu1 %v1233_v6  ;;  %v729_v6 = vld [vmem:[%s1884_s1 + $0x220] sm:$0xff] }
  0xed   : > { %v1323_v14 = vpack.c.bf16 %v731_v7, %v729_v6  ;;  %v768_v6 = vld [vmem:[%s1884_s1 + $0x358] sm:$0xff] }
  0xef   : > { %1236 = vmatpush1.bf16.msra.mxu1 %v1235_v11  ;;  %v736_v11 = vld [vmem:[%s1884_s1 + $0x258] sm:$0xff] }
  0xf0   : > { %1238 = vmatprep.subr.bf16.mxu1 %v1237_v12  ;;  %v1325_v17 = vpack.c.bf16 %v736_v11, %v734_v10  ;;  %v767_v10 = vld [vmem:[%s1884_s1 + $0x350] sm:$0xff]  ;;  %v770_v11 = vld [vmem:[%s1884_s1 + $0x368] sm:$0xff] }
  0xf3   : > { %1240 = vmatpush1.bf16.msra.mxu1 %v1239_v18  ;;  %v733_v18 = vld [vmem:[%s1884_s1 + $0x240] sm:$0xff] }
  0xf4   : > { %1242 = vmatprep.subr.bf16.mxu1 %v1241_v19  ;;  %v735_v19 = vld [vmem:[%s1884_s1 + $0x250] sm:$0xff] }
  0xf5   : > { %v1327_v23 = vpack.c.bf16 %v735_v19, %v733_v18  ;;  %v774_v18 = vld [vmem:[%s1884_s1 + $0x388] sm:$0xff]  ;;  %v776_v19 = vld [vmem:[%s1884_s1 + $0x398] sm:$0xff] }
  0xf6   : > { %v1365_v22 = vpack.c.bf16 %v776_v19, %v774_v18 }
  0xf7   : > { %1244 = vmatpush1.bf16.msra.mxu1 %v1243_v25  ;;  %v737_v25 = vld [vmem:[%s1884_s1 + $0x260] sm:$0xff] }
  0xf8   : > { %1246 = vmatprep.subr.bf16.mxu1 %v1245_v26  ;;  %v739_v26 = vld [vmem:[%s1884_s1 + $0x270] sm:$0xff] }
  0xf9   : > { %v1331_v29 = vpack.c.bf16 %v739_v26, %v737_v25  ;;  %v778_v25 = vld [vmem:[%s1884_s1 + $0x3a8] sm:$0xff]  ;;  %v780_v26 = vld [vmem:[%s1884_s1 + $0x3b8] sm:$0xff] }
  0xfa   : > { %v1369_v28 = vpack.c.bf16 %v780_v26, %v778_v25 }
  0xfb   : > { %1248 = vmatpush1.bf16.msra.mxu1 %v1247_v32  ;;  %v741_v32 = vld [vmem:[%s1884_s1 + $0x280] sm:$0xff] }
  0xfc   : > { %1250 = vmatprep.subr.bf16.mxu1 %v1249_v33  ;;  %v743_v33 = vld [vmem:[%s1884_s1 + $0x290] sm:$0xff] }
  0xff   : > { %1252 = vmatpush1.bf16.msra.mxu1 %v1251_v36  ;;  %v1335_v36 = vpack.c.bf16 %v743_v33, %v741_v32  ;;  %v782_v32 = vld [vmem:[%s1884_s1 + $0x3c8] sm:$0xff]  ;;  %v784_v33 = vld [vmem:[%s1884_s1 + $0x3d8] sm:$0xff] }
 0x100   : > { %v1373_v35 = vpack.c.bf16 %v784_v33, %v782_v32 }
 0x102   : > { %637 = vmatmul.mubr.f32.vlgmr.msra.gmra.mrb[4].mxu1 %v1986_v15 }
 0x103   : > { %642 = vmatprep.mubr.f32.mxu1 %v1991_v21 }
 0x106   : > { %643 = vmatmul.mubr.f32.gmra.mrb[6].mxu1 %v2000_v30 }
 0x195   : > { %v561_v57 = vpop.f32.mrb[0].mxu1 }
 0x196   : > { %v562_v58 = vadd.f32 %v561_v57, %v478_v55  ;;  %v563_v59 = vpop.f32.mrb[1].mxu1  ;;  %v758_v57 = vld [vmem:[%s1884_s1 + $0x308] sm:$0xff] }
 0x197   : > { %v564_v62 = vadd.f32 %v563_v59, %v482_v56 }
 0x198   : > { %v649_v1 = vmax.f32 %v562_v58, 0.0  ;;  %v760_v58 = vld [vmem:[%s1884_s1 + $0x318] sm:$0xff] }
 0x199   : > { %v650_v2 = vmax.f32 %v564_v62, 0.0  ;;  %v567_v4 = vpop.f32.mrb[2].mxu1  ;;  %v1349_v60 = vpack.c.bf16 %v760_v58, %v758_v57  ;;  %v759_v62 = vld [vmem:[%s1884_s1 + $0x310] sm:$0xff] }
 0x19a   : > { %v568_v8 = vadd.f32 %v567_v4, %v478_v55  ;;  %v569_v9 = vpop.f32.mrb[3].mxu1  ;;  %v753_v55 = vld [vmem:[%s1884_s1 + $0x2e0] sm:$0xff]  ;;  %v763_v4 = vld [vmem:[%s1884_s1 + $0x330] sm:$0xff] }
 0x19b   : > { %853 = vmatprep.mubr.f32.mxu0 %v650_v2  ;;  %v570_v12 = vadd.f32 %v569_v9, %v482_v56  ;;  %v755_v56 = vld [vmem:[%s1884_s1 + $0x2f0] sm:$0xff]  ;;  %v1353_v2 = vpack.c.bf16 %v764_v0, %v762_v63  ;;  %v765_v9 = vld [vmem:[%s1884_s1 + $0x340] sm:$0xff] }
 0x19c   : > { %854 = vmatmul.mubr.f32.vlgmr.msra.gmra.mrb[0].mxu0 %v649_v1  ;;  %v653_v13 = vmax.f32 %v568_v8, 0.0  ;;  %v1347_v59 = vpack.c.bf16 %v755_v56, %v753_v55  ;;  %v1351_v1 = vpack.c.bf16 %v759_v62, %v757_v61 }
 0x19d   : > { %1320 = vmatpush1.bf16.msra.mxu0 %v1319_v3  ;;  %v654_v16 = vmax.f32 %v570_v12, 0.0  ;;  %v761_v3 = vld [vmem:[%s1884_s1 + $0x320] sm:$0xff]  ;;  %v772_v12 = vld [vmem:[%s1884_s1 + $0x378] sm:$0xff] }
 0x19e   : > { %1322 = vmatprep.subr.bf16.mxu0 %v1321_v5  ;;  %v766_v5 = vld [vmem:[%s1884_s1 + $0x348] sm:$0xff]  ;;  %v1355_v7 = vpack.c.bf16 %v763_v4, %v761_v3 }
 0x19f   : > { %859 = vmatprep.mubr.f32.mxu0 %v654_v16  ;;  %v1357_v8 = vpack.c.bf16 %v768_v6, %v766_v5  ;;  %v769_v16 = vld [vmem:[%s1884_s1 + $0x360] sm:$0xff] }
 0x1a0   : > { %860 = vmatmul.mubr.f32.gmra.mrb[2].mxu0 %v653_v13  ;;  %v1359_v13 = vpack.c.bf16 %v767_v10, %v765_v9 }
 0x1a1   : > { %1324 = vmatpush1.bf16.msra.mxu0 %v1323_v14  ;;  %v1361_v14 = vpack.c.bf16 %v772_v12, %v770_v11 }
 0x1a2   : > { %1326 = vmatprep.subr.bf16.mxu0 %v1325_v17  ;;  %v771_v17 = vld [vmem:[%s1884_s1 + $0x370] sm:$0xff] }
 0x1a3   : > { %v1363_v20 = vpack.c.bf16 %v771_v17, %v769_v16 }
 0x1a5   : > { %1328 = vmatpush1.bf16.msra.mxu0 %v1327_v23  ;;  %v773_v23 = vld [vmem:[%s1884_s1 + $0x380] sm:$0xff] }
 0x1a6   : > { %1330 = vmatprep.subr.bf16.mxu0 %v1329_v24  ;;  %v775_v24 = vld [vmem:[%s1884_s1 + $0x390] sm:$0xff] }
 0x1a7   : > { %v1367_v27 = vpack.c.bf16 %v775_v24, %v773_v23 }
 0x1a9   : > { %1332 = vmatpush1.bf16.msra.mxu0 %v1331_v29  ;;  %v777_v29 = vld [vmem:[%s1884_s1 + $0x3a0] sm:$0xff] }
 0x1aa   : > { %1334 = vmatprep.subr.bf16.mxu0 %v1333_v31  ;;  %v779_v31 = vld [vmem:[%s1884_s1 + $0x3b0] sm:$0xff] }
 0x1ab   : > { %v1371_v34 = vpack.c.bf16 %v779_v31, %v777_v29 }
 0x1ad   : > { %1336 = vmatpush1.bf16.msra.mxu0 %v1335_v36  ;;  %v485_v36 = vsub.s32 2, %v2097_v51 }
 0x1ae   : > { %1338 = vmatprep.subr.bf16.mxu0 %v1337_v37  ;;  %v781_v37 = vld [vmem:[%s1884_s1 + $0x3c0] sm:$0xff] }
 0x1b1   : > { %1340 = vmatpush1.bf16.msra.mxu0 %v1339_v43  ;;  %v1375_v43 = vpack.c.bf16 %v783_v38, %v781_v37 }
 0x1b2   : > { %1342 = vmatprep.subr.bf16.mxu0 %v1341_v44  ;;  %v486_v44 = vrot.slane %v2105_v53, %v485_v36  ;;  %v657_v53 = vld [vmem:[#allocation2] sm:$0xff] }
 0x1b5   : > { %1344 = vmatpush1.bf16.msra.mxu0 %v1343_v49 }
 0x1b6   : > { %1346 = vmatprep.subr.bf16.mxu0 %v1345_v50  ;;  %v1379_v50 = vpack.c.bf16 %v787_v47, %v785_v46 }
 0x1b9   : > { %1348 = vmatpush1.bf16.msra.mxu0 %v1347_v59 }
 0x1ba   : > { %1350 = vmatprep.subr.bf16.mxu0 %v1349_v60 }
 0x1bd   : > { %1352 = vmatpush1.bf16.msra.mxu0 %v1351_v1 }
 0x1be   : > { %1354 = vmatprep.subr.bf16.mxu0 %v1353_v2  ;;  %v658_v2 = vld [vmem:[#allocation2 + $0x8] sm:$0xff] }
 0x1c1   : > { %1356 = vmatpush1.bf16.msra.mxu0 %v1355_v7  ;;  %v659_v7 = vld [vmem:[#allocation2 + $0x10] sm:$0xff] }
 0x1c2   : > { %1358 = vmatprep.subr.bf16.mxu0 %v1357_v8  ;;  %v660_v8 = vld [vmem:[#allocation2 + $0x18] sm:$0xff] }
 0x1c5   : > { %1360 = vmatpush1.bf16.msra.mxu0 %v1359_v13 }
 0x1c6   : > { %1362 = vmatprep.subr.bf16.mxu0 %v1361_v14  ;;  %v959_v14 = vld [vmem:[%s2237_s4] sm:$0x3] (!%p1117_p5) }
 0x1c7   : > { %v964_v17 = vrot.slane (!%p1117_p5), %v959_v14, %v477_v52  ;;  %v968_v18 = vrot.slane (!%p1117_p5), %v959_v14, %v481_v54 }
 0x1c9   : > { %1364 = vmatpush1.bf16.msra.mxu0 %v1363_v20 }
 0x1ca   : > { %1366 = vmatprep.subr.bf16.mxu0 %v1365_v22 }
 0x1cd   : > { %1368 = vmatpush1.bf16.msra.mxu0 %v1367_v27 }
 0x1ce   : > { %1370 = vmatprep.subr.bf16.mxu0 %v1369_v28 }
 0x1d1   : > { %1372 = vmatpush1.bf16.msra.mxu0 %v1371_v34 }
 0x1d2   : > { %1374 = vmatprep.subr.bf16.mxu0 %v1373_v35 }
 0x1d5   : > { %v638_v49 = vpop.f32.mrb[4].mxu1  ;;  %1376 = vmatpush1.bf16.msra.mxu0 %v1375_v43 }
 0x1d6   : > { %v639_v55 = vadd.f32 %v638_v49, %v486_v44  ;;  %v640_v56 = vpop.f32.mrb[5].mxu1  ;;  %1378 = vmatprep.subr.bf16.mxu0 %v1377_v45 }
 0x1d7   : > { %v641_v57 = vadd.f32 %v640_v56, %v490_v48 }
 0x1d8   : > { %v651_v60 = vmax.f32 %v639_v55, 0.0 }
 0x1d9   : > { %v652_v58 = vmax.f32 %v641_v57, 0.0  ;;  %v644_v59 = vpop.f32.mrb[6].mxu1  ;;  %1380 = vmatpush1.bf16.msra.mxu0 %v1379_v50 }
 0x1da   : > { %v645_v61 = vadd.f32 %v644_v59, %v486_v44  ;;  %v646_v62 = vpop.f32.mrb[7].mxu1 }
 0x1db   : > { %v647_v63 = vadd.f32 %v646_v62, %v490_v48  ;;  %930 = vmatprep.mubr.f32.mxu0 %v652_v58 }
 0x1dc   : > { %931 = vmatmul.mubr.f32.vlgmr.msra.gmra.mrb[0].mxu0 %v651_v60  ;;  %v655_v1 = vmax.f32 %v645_v61, 0.0 }
 0x1dd   : > { %v656_v0 = vmax.f32 %v647_v63, 0.0 }
 0x1df   : > { %936 = vmatprep.mubr.f32.mxu0 %v656_v0 }
 0x1e0   : > { %937 = vmatmul.mubr.f32.gmra.mrb[2].mxu0 %v655_v1 }
 0x2af   : > { %v932_v3 = vpop.f32.mrb[0].mxu0 }
 0x2b0   : > { %v943_v4 = vadd.f32 %v932_v3, %v657_v53  ;;  %v934_v5 = vpop.f32.mrb[1].mxu0 }
 0x2b1   : > { %v944_v6 = vadd.f32 %v934_v5, %v658_v2  ;;  %954 = sbr.rel (%p1117_p5) target bundleno = 708 (0x2c4), region = 60 }
 0x2b2   : > { %947 = vst [vmem:[#allocation2] sm:$0xff] %v943_v4 }
 0x2b3   : > { %948 = vst [vmem:[#allocation2 + $0x8] sm:$0xff] %v944_v6  ;;  %v938_v9 = vpop.f32.mrb[2].mxu0 }
 0x2b4   : > { %v945_v10 = vadd.f32 %v938_v9, %v659_v7  ;;  %v940_v11 = vpop.f32.mrb[3].mxu0 }
 0x2b5   : > { %v946_v12 = vadd.f32 %v940_v11, %v660_v8 }
 0x2b6   : > { %949 = vst [vmem:[#allocation2 + $0x10] sm:$0xff] %v945_v10 }
 0x2b7   : > { %950 = vst [vmem:[#allocation2 + $0x18] sm:$0xff] %v946_v12 }
 0x2b9   : > { %v955_v13 = vld [vmem:[#allocation2] sm:$0xff] }
 0x2ba   : > { %v956_v16 = vld [vmem:[#allocation2 + $0x8] sm:$0xff]  ;;  %v971_v22 = vadd.f32 %v964_v17, %v955_v13 }
 0x2bb   : > { %v972_v23 = vadd.f32 %v968_v18, %v956_v16 }
 0x2bc   : > { %v975_v26 = vadd.f32 %v971_v22, %v1986_v15 }
 0x2bd   : > { %v957_v19 = vld [vmem:[#allocation2 + $0x10] sm:$0xff]  ;;  %v976_v27 = vadd.f32 %v972_v23, %v1915_v42 }
 0x2be   : > { %v958_v20 = vld [vmem:[#allocation2 + $0x18] sm:$0xff]  ;;  %v973_v24 = vadd.f32 %v964_v17, %v957_v19  ;;  %979 = vst [vmem:[#allocation9] sm:$0xff] %v975_v26 }
 0x2bf   : > { %v974_v25 = vadd.f32 %v968_v18, %v958_v20  ;;  %980 = vst [vmem:[#allocation9 + $0x8] sm:$0xff] %v976_v27 }
 0x2c0   : > { %v977_v28 = vadd.f32 %v973_v24, %v2000_v30 }
 0x2c1   : > { %v978_v29 = vadd.f32 %v974_v25, %v1991_v21 }
 0x2c2   : > { %981 = vst [vmem:[#allocation9 + $0x10] sm:$0xff] %v977_v28 }
 0x2c3   : > { %982 = vst [vmem:[#allocation9 + $0x18] sm:$0xff] %v978_v29 }
 0x2c4 PF: > { %p1411_p1 = scmp.eq.s32.totalorder %s1776_s15, 1  ;;  %s1654_s21 = smov [#allocation9]  }
 0x2c5   : > { %s993_s12 = sshll.u32 %s1654_s21, 4  ;;  %s994_s12 = int_to_ptr.vmem [resolvable:$true] %s993_s12 }
 0x2c6   : > { %s1559_s25 = scalar_lea.vmem %s994_s12, 512  ;;  %p1566_p2 = scmp.lt.s32.totalorder %s994_s12, %s994_s12 }
 0x2c7   : > { %p1560_p4 = scmp.ne.s32.totalorder %s994_s12, %s1559_s25  ;;  %p1567_p7 = scmp.lt.s32.totalorder %s1559_s25, %s1559_s25 }
 0x2c9   : > { %p1561_p8 = pnand %p1560_p4, %p1411_p1  ;;  %p1568_p9 = por %p1567_p7, %p1566_p2 }
 0x2cb   : > { %p1562_p13 = pneg %p1561_p8 }
 0x2cd   : > { %p1569_p3 = pnand %p1568_p9, %p1562_p13 }
 0x2cf   : > { %1572 = shalt.err (!%p1569_p3)
}
 0x2d0   : > { %s1573_s10 = scalar_lea.hbm %s2238_s5, 512 }
 0x2d1   : > { %p1574_p11 = scmp.ne.s32.totalorder %s2238_s5, %s1573_s10  ;;  %p1579_p6 = scmp.lt.u32.totalorder %s1573_s10, %s2238_s5 }
 0x2d3   : > { %p1575_p12 = pnand %p1574_p11, %p1411_p1 }
 0x2d5   : > { %p1576_p10 = pneg %p1575_p12 }
 0x2d7   : > { %p1581_p0 = pnand %p1579_p6, %p1576_p10 }
 0x2d9   : > { %1584 = shalt.err (!%p1581_p0)
}
 0x2da   : > { %s1655_s13 = smov 256   ;;  %s1656_s17 = smov 16  }
 0x2db   : > { %1394 = dma.vmem_to_hbm [thread:$0]  (%p1411_p1), %s994_s12, 512, %s2238_s5, [#allocation5], %s1655_s13, %s1655_s13, %s1656_s17  }
 0x2dc   : > { %1618 = dma.done.wait (%p1411_p1), [#allocation5], 512  }
 0x2dd   : > { %1620 = vsyncadd (%p1411_p1), [#allocation5], 4294966784 }
 0x2de PF: > { %s20_s23 = sadd.s32 1, %s1643_s23   ;;  %s2258_s18 = smov %s1627_s19 }
 0x2df   : > { %p17_p5 = scmp.ge.s32.totalorder %s20_s23, 4   ;;  %s2259_s19 = smov %s1631_s20 }
 0x2e0   : > { %s2260_s20 = smov %s1731_s30  ;;  %s2261_s21 = smov %s1639_s22 }
 0x2e1   : > { %s2262_s22 = smov %s2264_s24  ;;  %19 = sbr.rel (!%p17_p5) target bundleno = 8 (0x8), region = 106 }
 0x2e8   :  { %1009 = vsyncpa [#allocation4], 1 }
 0x2e9   :  { %1011 = vsyncpa [#allocation4 + $0x1], 1 }
 0x2ea   :  { %1012 = vsyncpa [#allocation7], 1 }
 0x2eb   :  { %1014 = vsyncpa [#allocation7 + $0x1], 1 }
 0x2ec   :  { %1015 = vsyncpa [#allocation5], 1 }
 0x2ed   :  { %1017 = vsyncpa [#allocation5 + $0x1], 1 }

</bundles_post_ra>
